<compile_context>
chip_gen: v5e
topology: v5e:2x2
jax: 0.10.0
libtpu: 0.0.40
codegen_flags: <defaults>
</compile_context>

<pallas_src>
import jax
import jax.numpy as jnp
from jax.experimental import pallas as pl
from jax.experimental.pallas import tpu as pltpu


# ----------------------------- Pallas kernels -------------------------------


def _stats_kernel(qf_ref, kf_ref, gq_ref, gk_ref, sq_ref, sk_ref, qb_ref, kb_ref):
    """One seq tile: accumulate packed Gram matrices / column sums in f32 and
    re-emit the tile as lane-packed bf16 for the feature pass."""

    @pl.when(pl.program_id(1) == 0)
    def _():
        gq_ref[...] = jnp.zeros_like(gq_ref)
        gk_ref[...] = jnp.zeros_like(gk_ref)
        sq_ref[...] = jnp.zeros_like(sq_ref)
        sk_ref[...] = jnp.zeros_like(sk_ref)

    q = qf_ref[...]
    k = kf_ref[...]

    # Fused cast: the feature pass reads these bf16 tiles instead of a separate
    # wrapper-side cast pass over HBM.
    qb_ref[...] = q.astype(jnp.bfloat16)
    kb_ref[...] = k.astype(jnp.bfloat16)

    # Contract over the sublane (row) axis directly (q^T q) with no explicit
    # transpose op in the kernel body.
    dn = (((0,), (0,)), ((), ()))
    gq_ref[...] += jax.lax.dot_general(
        q, q, dimension_numbers=dn, preferred_element_type=jnp.float32)
    gk_ref[...] += jax.lax.dot_general(
        k, k, dimension_numbers=dn, preferred_element_type=jnp.float32)

    # Column sums via a ones-row MXU dot (free filler while HBM-bound).
    ones = jnp.ones((1, q.shape[0]), dtype=q.dtype)
    dn_sum = (((1,), (0,)), ((), ()))
    sq_ref[...] += jax.lax.dot_general(
        ones, q, dimension_numbers=dn_sum, preferred_element_type=jnp.float32)
    sk_ref[...] += jax.lax.dot_general(
        ones, k, dimension_numbers=dn_sum, preferred_element_type=jnp.float32)


def _feature_kernel(q_ref, k_ref, bt_ref, bias_ref, oq_ref, ok_ref):
    """oq = exp(q @ blockdiag(B^T) + bias), ok likewise, for one packed tile.
    exp runs in f32; the store casts to the requested output dtype."""
    bt = bt_ref[...]
    bias = bias_ref[...]
    yq = jnp.dot(q_ref[...], bt, preferred_element_type=jnp.float32)
    yk = jnp.dot(k_ref[...], bt, preferred_element_type=jnp.float32)
    oq_ref[...] = jnp.exp(yq + bias).astype(oq_ref.dtype)
    ok_ref[...] = jnp.exp(yk + bias).astype(ok_ref.dtype)


# ------------------------------ tiling helpers -------------------------------


def _cdiv(a, b):
    return -(-a // b)


def _round_up(x, m):
    return _cdiv(x, m) * m


def _choose_tiling(packed_raw, tile_rows):
    """Pick (n_cores, n_tiles, tile_r) so that tiles hold at most ~tile_rows
    packed rows, round-up padding stays small, there are a few pipelined steps
    per core when the sequence allows it, and the tile count is even for the
    dual-TensorCore (v7x) stats split."""
    n_tiles = _cdiv(packed_raw, tile_rows)
    # Aim for >= ~2 pipelined steps per core, but only when each tile still has
    # enough rows that the per-tile 16-row round-up stays well under ~10% waste.
    n_tiles = max(n_tiles, min(4, max(1, packed_raw // 160)))
    n_cores = 2 if n_tiles >= 2 else 1
    n_tiles = _round_up(n_tiles, n_cores)
    tile_r = _round_up(_cdiv(packed_raw, n_tiles), 16)
    return n_cores, n_tiles, tile_r


def _vmem_limit_bytes(tile_r, lanes):
    # Stats call footprint: 2 f32 inputs + 2 bf16 packed outputs, double
    # buffered, plus resident f32 accumulators; the feature call is smaller.
    step = tile_r * lanes
    need = 2 * (2 * step * 4 + 2 * step * 2) + 4 * lanes * lanes * 4 + (1 << 20)
    # 48 MiB cap leaves headroom on v7x's 64 MiB physical VMEM while allowing
    # the largest useful tiles on v5e/v6e (128 MiB).
    return int(min(max(need, 32 * 1024 * 1024), 48 * 1024 * 1024))


# ------------------------------ Pallas wrappers ------------------------------


def _stats(qp, kp, n_cores, tile_r):
    n, lanes = qp.shape
    steps = n // (n_cores * tile_r)

    def row_map(c, i):
        return (c * steps + i, 0)

    row_spec = pl.BlockSpec((tile_r, lanes), row_map)
    acc_spec = pl.BlockSpec((None, lanes, lanes), lambda c, i: (c, 0, 0))
    sum_spec = pl.BlockSpec((None, 1, lanes), lambda c, i: (c, 0, 0))

    out_shape = (
        jax.ShapeDtypeStruct((n_cores, lanes, lanes), jnp.float32),
        jax.ShapeDtypeStruct((n_cores, lanes, lanes), jnp.float32),
        jax.ShapeDtypeStruct((n_cores, 1, lanes), jnp.float32),
        jax.ShapeDtypeStruct((n_cores, 1, lanes), jnp.float32),
        jax.ShapeDtypeStruct((n, lanes), jnp.bfloat16),
        jax.ShapeDtypeStruct((n, lanes), jnp.bfloat16),
    )
    return pl.pallas_call(
        _stats_kernel,
        out_shape=out_shape,
        grid_spec=pltpu.PrefetchScalarGridSpec(
            num_scalar_prefetch=0,
            grid=(n_cores, steps),
            in_specs=[row_spec, row_spec],
            out_specs=(acc_spec, acc_spec, sum_spec, sum_spec, row_spec, row_spec),
        ),
        compiler_params=pltpu.CompilerParams(
            dimension_semantics=("parallel", "arbitrary"),
            vmem_limit_bytes=_vmem_limit_bytes(tile_r, lanes),
        ),
    )(qp, kp)


def _features(qb, kb, bt_block, bias_row, tile_r, out_dtype):
    n, lanes = qb.shape
    row_spec = pl.BlockSpec((tile_r, lanes), lambda i: (i, 0))
    out_shape = (
        jax.ShapeDtypeStruct((n, lanes), out_dtype),
        jax.ShapeDtypeStruct((n, lanes), out_dtype),
    )
    return pl.pallas_call(
        _feature_kernel,
        out_shape=out_shape,
        grid_spec=pltpu.PrefetchScalarGridSpec(
            num_scalar_prefetch=0,
            grid=(n // tile_r,),
            in_specs=[
                row_spec,
                row_spec,
                pl.BlockSpec((lanes, lanes), lambda i: (0, 0)),
                pl.BlockSpec((1, lanes), lambda i: (0, 0)),
            ],
            out_specs=(row_spec, row_spec),
        ),
        compiler_params=pltpu.CompilerParams(
            dimension_semantics=("parallel",),
            vmem_limit_bytes=_vmem_limit_bytes(tile_r, lanes),
        ),
    )(qb, kb, bt_block, bias_row)


# ------------------------- module init + forward -----------------------------


def init_random_matrix(key, d_k, m):
    """Mirrors __init__: eigenvectors of (randn(d_k, M) @ randn(d_k, M)^T)."""
    # TODO(synk): eigh has no Pallas primitive; plain XLA on a (d_k, d_k) matrix.
    rm = jax.random.normal(key, (d_k, m), dtype=jnp.float32)
    _, eig_vectors = jnp.linalg.eigh(rm @ rm.T)
    return eig_vectors  # (d_k, d_k); A/B/C/D are overwritten in forward()


def symmetric_random_features(random_matrix, q, k, omega_key, *,
                              tile_rows=1024, out_dtype=jnp.bfloat16):
    """Forward pass. q, k: (1, seq, d_k) float32. Returns (exp_q, exp_k)."""
    assert q.shape[0] == 1 and k.shape[0] == 1, "module only valid for batch=1"
    _, seq_len, d_k = q.shape
    m = random_matrix.shape[0]
    assert m == d_k, "module requires M == d_k for bias broadcasting"

    # ---- lane packing: view (seq, d_k) as (seq/pack, pack*d_k), lanes >= 128.
    pack = (128 // d_k) if (d_k <= 128 and 128 % d_k == 0) else 1
    lanes = pack * d_k

    packed_raw = _cdiv(seq_len, pack)
    n_cores, n_tiles, tile_r = _choose_tiling(packed_raw, tile_rows)
    packed_len = n_tiles * tile_r
    padded_seq = packed_len * pack

    def _pack(x2d):
        xp = jnp.pad(x2d.astype(jnp.float32),
                     ((0, padded_seq - seq_len), (0, 0)))
        return xp.reshape(packed_len, lanes)

    qp = _pack(q[0])
    kp = _pack(k[0])

    # --- hot path 1: f32 packed Gram matrices + column sums, plus the packed
    #     bf16 q/k that the feature pass will consume (Pallas) ---
    gq, gk, sq, sk, qb, kb = _stats(qp, kp, n_cores, tile_r)

    # Collapse the per-core partials, then un-pack the lane packing.
    gq = gq.sum(axis=0)
    gk = gk.sum(axis=0)
    idx = jnp.arange(pack)
    gram_q = gq.reshape(pack, d_k, pack, d_k)[idx, :, idx, :].sum(axis=0)
    gram_k = gk.reshape(pack, d_k, pack, d_k)[idx, :, idx, :].sum(axis=0)
    sum_q = sq.sum(axis=(0, 1)).reshape(pack, d_k).sum(axis=0)
    sum_k = sk.sum(axis=(0, 1)).reshape(pack, d_k).sum(axis=0)

    m1 = gram_q / seq_len
    m2 = gram_k / seq_len
    mu4 = sum_q / seq_len
    mu5 = sum_k / seq_len
    matrix = m1 + jnp.outer(mu4, mu5) + jnp.outer(mu5, mu4) + m2

    # --- tiny (d_k, d_k) decomposition: plain JAX glue ---
    # TODO(synk): SVD has no Pallas primitive; plain XLA on a (d_k, d_k) matrix.
    q3, lambda3, _ = jnp.linalg.svd(matrix)
    a_diag = (1.0 / 16.0) * (
        1.0 - 2.0 * lambda3
        - jnp.sqrt((2.0 * lambda3 + 1.0) ** 2 + 8.0 * lambda3))
    one_minus_4a = 1.0 - 4.0 * a_diag                       # > 0 for lambda3 >= 0
    b_mat = jnp.sqrt(one_minus_4a)[:, None] * q3.T          # B = sqrt(I-4A) @ Q3^T
    # D = det(I - 4A)^(1/4), in log space to avoid prod over/underflow.
    d_scalar = jnp.exp(0.25 * jnp.sum(jnp.log(one_minus_4a)))

    # omega = random_matrix @ randn(M, d_k)^T  (deterministic draw here)
    w = jax.random.normal(omega_key, (m, d_k), dtype=jnp.float32)
    omega = random_matrix @ w.T                              # (d_k, M)
    bias = 0.5 * jnp.sum(omega ** 2, axis=0) + d_scalar      # (M,) == (d_k,)

    # Lane-dense operands for the packed feature kernel.
    bt_block = jnp.kron(jnp.eye(pack, dtype=jnp.float32),
                        b_mat.T).astype(jnp.bfloat16)        # (lanes, lanes)
    bias_row = jnp.tile(bias, pack).reshape(1, lanes).astype(jnp.float32)

    # --- hot path 2: exp(x @ B^T + bias) for q and k in one call (Pallas) ---
    eq_p, ek_p = _features(qb, kb, bt_block, bias_row, tile_r, out_dtype)
    exp_q = eq_p.reshape(padded_seq, d_k)[:seq_len][None]
    exp_k = ek_p.reshape(padded_seq, d_k)[:seq_len][None]
    return exp_q, exp_k


# ------------------------------ pure-JAX reference ----------------------------


def _reference(random_matrix, q, k, omega_key):
    """Pure-JAX f32 mirror of the PyTorch forward (validation only)."""
    hp = jax.lax.Precision.HIGHEST
    qf = q[0].astype(jnp.float32)
    kf = k[0].astype(jnp.float32)
    seq_len, d_k = qf.shape
    m1 = jnp.matmul(qf.T, qf, precision=hp) / seq_len
    m2 = jnp.matmul(kf.T, kf, precision=hp) / seq_len
    mu4 = qf.mean(axis=0)
    mu5 = kf.mean(axis=0)
    matrix = m1 + jnp.outer(mu4, mu5) + jnp.outer(mu5, mu4) + m2
    q3, lam, _ = jnp.linalg.svd(matrix)
    a_diag = (1.0 / 16.0) * (1.0 - 2.0 * lam
                             - jnp.sqrt((2.0 * lam + 1.0) ** 2 + 8.0 * lam))
    b_mat = jnp.sqrt(1.0 - 4.0 * a_diag)[:, None] * q3.T
    d_scalar = jnp.prod(1.0 - 4.0 * a_diag) ** 0.25
    w = jax.random.normal(omega_key, (random_matrix.shape[0], d_k),
                          dtype=jnp.float32)
    omega = random_matrix @ w.T
    bias = 0.5 * jnp.sum(omega ** 2, axis=0) + d_scalar
    eq = jnp.exp(jnp.matmul(qf, b_mat.T, precision=hp) + bias)
    ek = jnp.exp(jnp.matmul(kf, b_mat.T, precision=hp) + bias)
    return eq[None], ek[None]


# ---------------------------------- main -------------------------------------

if __name__ == "__main__":
    d_k = 32
    M = 32                 # must equal d_k for the module's broadcast to be valid
    batch, seq = 1, 100    # non-multiple of the tile to exercise the padding path

    key = jax.random.PRNGKey(0)
    k_q, k_k, k_init, k_omega = jax.random.split(key, 4)

    # Small-scale inputs keep the (unclamped) exp away from overflow.
    q = 0.1 * jax.random.normal(k_q, (batch, seq, d_k), dtype=jnp.float32)
    k = 0.1 * jax.random.normal(k_k, (batch, seq, d_k), dtype=jnp.float32)

    random_matrix = init_random_matrix(k_init, d_k, M)

    exp_q, exp_k = symmetric_random_features(random_matrix, q, k, k_omega)
    jax.block_until_ready((exp_q, exp_k))

    assert exp_q.shape == (batch, seq, d_k)
    assert exp_k.shape == (batch, seq, d_k)
    exp_q32 = exp_q.astype(jnp.float32)
    exp_k32 = exp_k.astype(jnp.float32)
    assert bool(jnp.all(jnp.isfinite(exp_q32))) and bool(jnp.all(jnp.isfinite(exp_k32)))
    assert bool(jnp.all(exp_q32 > 0)) and bool(jnp.all(exp_k32 > 0))

    # Loose parity check vs. a pure-JAX f32 reference: statistics are f32 in the
    # kernel, so the remaining error is the intended bf16 feature path / bf16
    # stores (~1%); allow 10x headroom.
    ref_q, ref_k = _reference(random_matrix, q, k, k_omega)
    rel_q = float(jnp.max(jnp.abs(exp_q32 - ref_q) / ref_q))
    rel_k = float(jnp.max(jnp.abs(exp_k32 - ref_k) / ref_k))
    assert rel_q < 0.1 and rel_k < 0.1, (rel_q, rel_k)

    print("KERNEL_OK")
</pallas_src>

<mosaic_0001>
module attributes {stable_mosaic.version = 11 : i64} {
  func.func @_stats_kernel(%arg0: i32, %arg1: i32, %arg2: memref<32x128xf32, #tpu.memory_space<vmem>>, %arg3: memref<32x128xf32, #tpu.memory_space<vmem>>, %arg4: memref<1x128x128xf32, #tpu.memory_space<vmem>>, %arg5: memref<1x128x128xf32, #tpu.memory_space<vmem>>, %arg6: memref<1x1x128xf32, #tpu.memory_space<vmem>>, %arg7: memref<1x1x128xf32, #tpu.memory_space<vmem>>, %arg8: memref<32x128xbf16, #tpu.memory_space<vmem>>, %arg9: memref<32x128xbf16, #tpu.memory_space<vmem>>) attributes {dimension_semantics = [#tpu.dimension_semantics<parallel>, #tpu.dimension_semantics<arbitrary>], iteration_bounds = array<i64: 1, 1>, scalar_prefetch = 0 : i64, scratch_operands = 0 : i64, tpu.core_type = #tpu.core_type<tc>, window_params = [{transform_indices = @transform_0, window_bounds = array<i64: 32, 128>}, {transform_indices = @transform_1, window_bounds = array<i64: 32, 128>}, {transform_indices = @transform_2, window_bounds = array<i64: 1, 128, 128>}, {transform_indices = @transform_3, window_bounds = array<i64: 1, 128, 128>}, {transform_indices = @transform_4, window_bounds = array<i64: 1, 1, 128>}, {transform_indices = @transform_5, window_bounds = array<i64: 1, 1, 128>}, {transform_indices = @transform_6, window_bounds = array<i64: 32, 128>}, {transform_indices = @transform_7, window_bounds = array<i64: 32, 128>}]} {
    %c0_i32 = arith.constant 0 : i32
    %0 = arith.cmpi eq, %arg1, %c0_i32 : i32
    %1 = arith.extui %0 : i1 to i32
    %c0_i32_0 = arith.constant 0 : i32
    %2 = arith.cmpi ne, %1, %c0_i32_0 : i32
    scf.if %2 {
      %cst_36 = arith.constant 0.000000e+00 : f32
      %38 = vector.broadcast %cst_36 : f32 to vector<128x128xf32>
      %c0_37 = arith.constant 0 : index
      %c0_38 = arith.constant 0 : index
      %c0_39 = arith.constant 0 : index
      %39 = vector.load %arg4[%c0_37, %c0_38, %c0_39] : memref<1x128x128xf32, #tpu.memory_space<vmem>>, vector<1x128x128xf32>
      %40 = vector.shape_cast %39 : vector<1x128x128xf32> to vector<128x128xf32>
      %41 = vector.shape_cast %38 : vector<128x128xf32> to vector<1x128x128xf32>
      tpu.vector_store %arg4[%c0_37, %c0_38, %c0_39], %41 {strides = array<i32>} : memref<1x128x128xf32, #tpu.memory_space<vmem>>, vector<1x128x128xf32>,
      %cst_40 = arith.constant 0.000000e+00 : f32
      %42 = vector.broadcast %cst_40 : f32 to vector<128x128xf32>
      %c0_41 = arith.constant 0 : index
      %c0_42 = arith.constant 0 : index
      %c0_43 = arith.constant 0 : index
      %43 = vector.load %arg5[%c0_41, %c0_42, %c0_43] : memref<1x128x128xf32, #tpu.memory_space<vmem>>, vector<1x128x128xf32>
      %44 = vector.shape_cast %43 : vector<1x128x128xf32> to vector<128x128xf32>
      %45 = vector.shape_cast %42 : vector<128x128xf32> to vector<1x128x128xf32>
      tpu.vector_store %arg5[%c0_41, %c0_42, %c0_43], %45 {strides = array<i32>} : memref<1x128x128xf32, #tpu.memory_space<vmem>>, vector<1x128x128xf32>,
      %cst_44 = arith.constant 0.000000e+00 : f32
      %46 = vector.broadcast %cst_44 : f32 to vector<1x128xf32>
      %c0_45 = arith.constant 0 : index
      %c0_46 = arith.constant 0 : index
      %c0_47 = arith.constant 0 : index
      %47 = vector.load %arg6[%c0_45, %c0_46, %c0_47] : memref<1x1x128xf32, #tpu.memory_space<vmem>>, vector<1x1x128xf32>
      %48 = vector.shape_cast %47 : vector<1x1x128xf32> to vector<1x128xf32>
      %49 = vector.shape_cast %46 : vector<1x128xf32> to vector<1x1x128xf32>
      tpu.vector_store %arg6[%c0_45, %c0_46, %c0_47], %49 {strides = array<i32>} : memref<1x1x128xf32, #tpu.memory_space<vmem>>, vector<1x1x128xf32>,
      %cst_48 = arith.constant 0.000000e+00 : f32
      %50 = vector.broadcast %cst_48 : f32 to vector<1x128xf32>
      %c0_49 = arith.constant 0 : index
      %c0_50 = arith.constant 0 : index
      %c0_51 = arith.constant 0 : index
      %51 = vector.load %arg7[%c0_49, %c0_50, %c0_51] : memref<1x1x128xf32, #tpu.memory_space<vmem>>, vector<1x1x128xf32>
      %52 = vector.shape_cast %51 : vector<1x1x128xf32> to vector<1x128xf32>
      %53 = vector.shape_cast %50 : vector<1x128xf32> to vector<1x1x128xf32>
      tpu.vector_store %arg7[%c0_49, %c0_50, %c0_51], %53 {strides = array<i32>} : memref<1x1x128xf32, #tpu.memory_space<vmem>>, vector<1x1x128xf32>,
    } else {
    }
    %c0 = arith.constant 0 : index
    %c0_1 = arith.constant 0 : index
    %3 = vector.load %arg2[%c0, %c0_1] : memref<32x128xf32, #tpu.memory_space<vmem>>, vector<32x128xf32>
    %c0_2 = arith.constant 0 : index
    %c0_3 = arith.constant 0 : index
    %4 = vector.load %arg3[%c0_2, %c0_3] : memref<32x128xf32, #tpu.memory_space<vmem>>, vector<32x128xf32>
    %5 = arith.truncf %3 : vector<32x128xf32> to vector<32x128xbf16>
    %c0_4 = arith.constant 0 : index
    %c0_5 = arith.constant 0 : index
    %6 = vector.load %arg8[%c0_4, %c0_5] : memref<32x128xbf16, #tpu.memory_space<vmem>>, vector<32x128xbf16>
    tpu.vector_store %arg8[%c0_4, %c0_5], %5 {strides = array<i32>} : memref<32x128xbf16, #tpu.memory_space<vmem>>, vector<32x128xbf16>,
    %7 = arith.truncf %4 : vector<32x128xf32> to vector<32x128xbf16>
    %c0_6 = arith.constant 0 : index
    %c0_7 = arith.constant 0 : index
    %8 = vector.load %arg9[%c0_6, %c0_7] : memref<32x128xbf16, #tpu.memory_space<vmem>>, vector<32x128xbf16>
    tpu.vector_store %arg9[%c0_6, %c0_7], %7 {strides = array<i32>} : memref<32x128xbf16, #tpu.memory_space<vmem>>, vector<32x128xbf16>,
    %c0_8 = arith.constant 0 : index
    %c0_9 = arith.constant 0 : index
    %c0_10 = arith.constant 0 : index
    %9 = vector.load %arg4[%c0_8, %c0_9, %c0_10] : memref<1x128x128xf32, #tpu.memory_space<vmem>>, vector<1x128x128xf32>
    %10 = vector.shape_cast %9 : vector<1x128x128xf32> to vector<128x128xf32>
    %cst = arith.constant dense<0.000000e+00> : vector<128x128xf32>
    %11 = tpu.matmul %3, %3, %cst {dimension_numbers = #tpu.dot_dimension_numbers<[0], [0], [1], [1], [0, 1, 1, 1], [], []>} : vector<32x128xf32>, vector<32x128xf32>, vector<128x128xf32> -> vector<128x128xf32>
    %12 = arith.addf %10, %11 : vector<128x128xf32>
    %c0_11 = arith.constant 0 : index
    %c0_12 = arith.constant 0 : index
    %c0_13 = arith.constant 0 : index
    %13 = vector.load %arg4[%c0_11, %c0_12, %c0_13] : memref<1x128x128xf32, #tpu.memory_space<vmem>>, vector<1x128x128xf32>
    %14 = vector.shape_cast %13 : vector<1x128x128xf32> to vector<128x128xf32>
    %15 = vector.shape_cast %12 : vector<128x128xf32> to vector<1x128x128xf32>
    tpu.vector_store %arg4[%c0_11, %c0_12, %c0_13], %15 {strides = array<i32>} : memref<1x128x128xf32, #tpu.memory_space<vmem>>, vector<1x128x128xf32>,
    %c0_14 = arith.constant 0 : index
    %c0_15 = arith.constant 0 : index
    %c0_16 = arith.constant 0 : index
    %16 = vector.load %arg5[%c0_14, %c0_15, %c0_16] : memref<1x128x128xf32, #tpu.memory_space<vmem>>, vector<1x128x128xf32>
    %17 = vector.shape_cast %16 : vector<1x128x128xf32> to vector<128x128xf32>
    %cst_17 = arith.constant dense<0.000000e+00> : vector<128x128xf32>
    %18 = tpu.matmul %4, %4, %cst_17 {dimension_numbers = #tpu.dot_dimension_numbers<[0], [0], [1], [1], [0, 1, 1, 1], [], []>} : vector<32x128xf32>, vector<32x128xf32>, vector<128x128xf32> -> vector<128x128xf32>
    %19 = arith.addf %17, %18 : vector<128x128xf32>
    %c0_18 = arith.constant 0 : index
    %c0_19 = arith.constant 0 : index
    %c0_20 = arith.constant 0 : index
    %20 = vector.load %arg5[%c0_18, %c0_19, %c0_20] : memref<1x128x128xf32, #tpu.memory_space<vmem>>, vector<1x128x128xf32>
    %21 = vector.shape_cast %20 : vector<1x128x128xf32> to vector<128x128xf32>
    %22 = vector.shape_cast %19 : vector<128x128xf32> to vector<1x128x128xf32>
    tpu.vector_store %arg5[%c0_18, %c0_19, %c0_20], %22 {strides = array<i32>} : memref<1x128x128xf32, #tpu.memory_space<vmem>>, vector<1x128x128xf32>,
    %cst_21 = arith.constant 1.000000e+00 : f32
    %23 = vector.broadcast %cst_21 : f32 to vector<1x32xf32>
    %c0_22 = arith.constant 0 : index
    %c0_23 = arith.constant 0 : index
    %c0_24 = arith.constant 0 : index
    %24 = vector.load %arg6[%c0_22, %c0_23, %c0_24] : memref<1x1x128xf32, #tpu.memory_space<vmem>>, vector<1x1x128xf32>
    %25 = vector.shape_cast %24 : vector<1x1x128xf32> to vector<1x128xf32>
    %cst_25 = arith.constant dense<0.000000e+00> : vector<1x128xf32>
    %26 = tpu.matmul %23, %3, %cst_25 {dimension_numbers = #tpu.dot_dimension_numbers<[1], [0], [0], [1], [0, 0, 1, 1], [], []>} : vector<1x32xf32>, vector<32x128xf32>, vector<1x128xf32> -> vector<1x128xf32>
    %27 = arith.addf %25, %26 : vector<1x128xf32>
    %c0_26 = arith.constant 0 : index
    %c0_27 = arith.constant 0 : index
    %c0_28 = arith.constant 0 : index
    %28 = vector.load %arg6[%c0_26, %c0_27, %c0_28] : memref<1x1x128xf32, #tpu.memory_space<vmem>>, vector<1x1x128xf32>
    %29 = vector.shape_cast %28 : vector<1x1x128xf32> to vector<1x128xf32>
    %30 = vector.shape_cast %27 : vector<1x128xf32> to vector<1x1x128xf32>
    tpu.vector_store %arg6[%c0_26, %c0_27, %c0_28], %30 {strides = array<i32>} : memref<1x1x128xf32, #tpu.memory_space<vmem>>, vector<1x1x128xf32>,
    %c0_29 = arith.constant 0 : index
    %c0_30 = arith.constant 0 : index
    %c0_31 = arith.constant 0 : index
    %31 = vector.load %arg7[%c0_29, %c0_30, %c0_31] : memref<1x1x128xf32, #tpu.memory_space<vmem>>, vector<1x1x128xf32>
    %32 = vector.shape_cast %31 : vector<1x1x128xf32> to vector<1x128xf32>
    %cst_32 = arith.constant dense<0.000000e+00> : vector<1x128xf32>
    %33 = tpu.matmul %23, %4, %cst_32 {dimension_numbers = #tpu.dot_dimension_numbers<[1], [0], [0], [1], [0, 0, 1, 1], [], []>} : vector<1x32xf32>, vector<32x128xf32>, vector<1x128xf32> -> vector<1x128xf32>
    %34 = arith.addf %32, %33 : vector<1x128xf32>
    %c0_33 = arith.constant 0 : index
    %c0_34 = arith.constant 0 : index
    %c0_35 = arith.constant 0 : index
    %35 = vector.load %arg7[%c0_33, %c0_34, %c0_35] : memref<1x1x128xf32, #tpu.memory_space<vmem>>, vector<1x1x128xf32>
    %36 = vector.shape_cast %35 : vector<1x1x128xf32> to vector<1x128xf32>
    %37 = vector.shape_cast %34 : vector<1x128xf32> to vector<1x1x128xf32>
    tpu.vector_store %arg7[%c0_33, %c0_34, %c0_35], %37 {strides = array<i32>} : memref<1x1x128xf32, #tpu.memory_space<vmem>>, vector<1x1x128xf32>,
    return
  }
  func.func @transform_0(%arg0: i32, %arg1: i32) -> (i32, i32) {
    %c1_i32 = arith.constant 1 : i32
    %0 = arith.muli %arg0, %c1_i32 : i32
    %1 = arith.addi %0, %arg1 : i32
    %c0_i32 = arith.constant 0 : i32
    %c0_i32_0 = arith.constant 0 : i32
    return %1, %c0_i32 : i32, i32
  }
  func.func @transform_1(%arg0: i32, %arg1: i32) -> (i32, i32) {
    %c1_i32 = arith.constant 1 : i32
    %0 = arith.muli %arg0, %c1_i32 : i32
    %1 = arith.addi %0, %arg1 : i32
    %c0_i32 = arith.constant 0 : i32
    %c0_i32_0 = arith.constant 0 : i32
    return %1, %c0_i32 : i32, i32
  }
  func.func @transform_2(%arg0: i32, %arg1: i32) -> (i32, i32, i32) {
    %c0_i32 = arith.constant 0 : i32
    %c0_i32_0 = arith.constant 0 : i32
    %c0_i32_1 = arith.constant 0 : i32
    return %arg0, %c0_i32, %c0_i32_0 : i32, i32, i32
  }
  func.func @transform_3(%arg0: i32, %arg1: i32) -> (i32, i32, i32) {
    %c0_i32 = arith.constant 0 : i32
    %c0_i32_0 = arith.constant 0 : i32
    %c0_i32_1 = arith.constant 0 : i32
    return %arg0, %c0_i32, %c0_i32_0 : i32, i32, i32
  }
  func.func @transform_4(%arg0: i32, %arg1: i32) -> (i32, i32, i32) {
    %c0_i32 = arith.constant 0 : i32
    %c0_i32_0 = arith.constant 0 : i32
    %c0_i32_1 = arith.constant 0 : i32
    return %arg0, %c0_i32, %c0_i32_0 : i32, i32, i32
  }
  func.func @transform_5(%arg0: i32, %arg1: i32) -> (i32, i32, i32) {
    %c0_i32 = arith.constant 0 : i32
    %c0_i32_0 = arith.constant 0 : i32
    %c0_i32_1 = arith.constant 0 : i32
    return %arg0, %c0_i32, %c0_i32_0 : i32, i32, i32
  }
  func.func @transform_6(%arg0: i32, %arg1: i32) -> (i32, i32) {
    %c1_i32 = arith.constant 1 : i32
    %0 = arith.muli %arg0, %c1_i32 : i32
    %1 = arith.addi %0, %arg1 : i32
    %c0_i32 = arith.constant 0 : i32
    %c0_i32_0 = arith.constant 0 : i32
    return %1, %c0_i32 : i32, i32
  }
  func.func @transform_7(%arg0: i32, %arg1: i32) -> (i32, i32) {
    %c1_i32 = arith.constant 1 : i32
    %0 = arith.muli %arg0, %c1_i32 : i32
    %1 = arith.addi %0, %arg1 : i32
    %c0_i32 = arith.constant 0 : i32
    %c0_i32_0 = arith.constant 0 : i32
    return %1, %c0_i32 : i32, i32
  }
}

</mosaic_0001>

<bundles_post_ra>
// kernel: tpu_custom_call.1
= control target key start
LH: loop header
LB: loop body
LE: loop exit
PB: predicated region body
PF: predicated region fallthrough
CT: control target
= control target key end

     0   :  { %13 = vsyncpa [#allocation3], 0  ;;  %s1091_s0 = inlined_call_operand.hbm [shape: f32[32,128], index: 0, kind: input, shape index: {}]   ;;  %s1092_s1 = inlined_call_operand.hbm [shape: f32[32,128], index: 1, kind: input, shape index: {}]   ;;  %s1093_s2 = inlined_call_operand.hbm [shape: f32[1,128,128], index: 2, kind: output, shape index: {0}]   ;;  %s1094_s3 = inlined_call_operand.hbm [shape: f32[1,128,128], index: 3, kind: output, shape index: {1}]   ;;  %s1095_s4 = inlined_call_operand.hbm [shape: f32[1,1,128], index: 4, kind: output, shape index: {2}]   ;;  %s1096_s5 = inlined_call_operand.hbm [shape: f32[1,1,128], index: 5, kind: output, shape index: {3}]   ;;  %s1097_s6 = inlined_call_operand.hbm [shape: bf16[32,128], index: 6, kind: output, shape index: {4}]   ;;  %s1098_s7 = inlined_call_operand.hbm [shape: bf16[32,128], index: 7, kind: output, shape index: {5}]  }
   0x1   :  { %14 = vsyncpa [#allocation6], 0 }
   0x2   :  { %15 = vsyncpa [#allocation4], 0 }
   0x3   :  { %16 = vsyncpa [#allocation9], 0 }
   0x4   :  { %17 = vsyncpa [#allocation12], 0 }
   0x5   :  { %18 = vsyncpa [#allocation15], 0  ;;  %s27_s26 = sshll.u32 %s1091_s0, 4  ;;  %s961_s27 = smov [#allocation2]   ;;  %s28_s26 = int_to_ptr.hbm [resolvable:$true] %s27_s26 }
   0x6   :  { %s29_s28 = sshll.u32 %s961_s27, 4  ;;  %s44_s8 = sshll.u32 %s1092_s1, 4  ;;  %s30_s28 = int_to_ptr.vmem [resolvable:$true] %s29_s28  ;;  %s45_s8 = int_to_ptr.hbm [resolvable:$true] %s44_s8 }
   0x7   :  { %s962_s9 = smov 128   ;;  %s963_s10 = smov 8  }
   0x8   :  { %35 = dma.hbm_to_vmem [thread:$0]  %s28_s26, 512, %s30_s28, [#allocation3], %s962_s9, %s962_s9, %s963_s10  }
   0x9   :  { %s964_s11 = smov [#allocation5]  }
   0xa   :  { %s46_s12 = sshll.u32 %s964_s11, 4  ;;  %s47_s12 = int_to_ptr.vmem [resolvable:$true] %s46_s12 }
   0xb   :  { %52 = dma.hbm_to_vmem [thread:$0]  %s45_s8, 512, %s47_s12, [#allocation6], %s962_s9, %s962_s9, %s963_s10  }
   0xc   :  { %949 = dma.done.wait [#allocation3], 512  }
   0xd   :  { %950 = vsyncadd [#allocation3], 4294966784 }
   0xe   :  { %951 = dma.done.wait [#allocation6], 512  }
   0xf   :  { %952 = vsyncadd [#allocation6], 4294966784  ;;  %v111_v0 = vld [vmem:[#allocation5] sm:$0xff]  ;;  %v112_v2 = vld [vmem:[#allocation5 + $0x8] sm:$0xff]  ;;  %vm179_vm0 = vcmask 261120   ;;  %v965_v36 = vmov 0.0  }
  0x10   :  { %v107_v1 = vld [vmem:[#allocation2] sm:$0xff]  ;;  %341 = vxpose.xlu0.b32.start [1/4] (short) %v111_v0, 128  ;;  %v726_v3 = vpack.c.bf16 %v112_v2, %v111_v0  ;;  %v108_v4 = vld [vmem:[#allocation2 + $0x8] sm:$0xff]  ;;  %v113_v5 = vld [vmem:[#allocation5 + $0x10] sm:$0xff]  ;;  %105 = vst [vmem:[#allocation10] sm:$0x1] %v965_v36  ;;  %v966_v47 = vmov 1.0  }
  0x11   :  { %147 = vxpose.xlu1.b32.start [1/4] (short) %v107_v1, 128  ;;  %v716_v6 = vpack.c.bf16 %v108_v4, %v107_v1  ;;  %v109_v7 = vld [vmem:[#allocation2 + $0x10] sm:$0xff]  ;;  %v114_v8 = vld [vmem:[#allocation5 + $0x18] sm:$0xff]  ;;  %106 = vst [vmem:[#allocation11] sm:$0x1] %v965_v36  ;;  %s967_s0 = smov [#allocation14]   ;;  %s642_s15 = sshll.u32 %s1098_s7, 4  ;;  %s643_s15 = int_to_ptr.hbm [resolvable:$true] %s642_s15 }
  0x12   :  { %v110_v9 = vld [vmem:[#allocation2 + $0x18] sm:$0xff]  ;;  %727 = vst [vmem:[#allocation14] sm:$0xff] %v726_v3   ;;  %v731_v10 = vpack.c.bf16 %v114_v8, %v113_v5  ;;  %433 = vmatpush.msra.mxu1 %v114_v8  ;;  %739 = vmatpush.msra.mxu3 %v114_v8  ;;  %s640_s1 = sshll.u32 %s967_s0, 4  ;;  %s968_s16 = smov 64   ;;  %s641_s1 = int_to_ptr.vmem [resolvable:$true] %s640_s1 }
  0x13   :  { %v721_v11 = vpack.c.bf16 %v110_v9, %v109_v7  ;;  %240 = vmatpush.msra.mxu0 %v110_v9  ;;  %717 = vst [vmem:[#allocation13] sm:$0xff] %v716_v6   ;;  %735 = vmatpush.msra.mxu2 %v110_v9  ;;  %s969_s17 = smov 4   ;;  %s970_s7 = smov [#allocation8]  }
  0x14   :  { %734 = vst [vmem:[#allocation14 + $0x8] sm:$0xff] %v731_v10   ;;  %434 = vmatpush.msra.mxu1 %v113_v5  ;;  %740 = vmatpush.msra.mxu3 %v113_v5  ;;  %s584_s18 = sshll.u32 %s970_s7, 4  ;;  %s586_s21 = sshll.u32 %s1094_s3, 4  ;;  %s585_s18 = int_to_ptr.vmem [resolvable:$true] %s584_s18  ;;  %s587_s21 = int_to_ptr.hbm [resolvable:$true] %s586_s21 }
  0x15   :  { %241 = vmatpush.msra.mxu0 %v109_v7  ;;  %733 = vst [vmem:[#allocation13 + $0x8] sm:$0xff] %v721_v11   ;;  %736 = vmatpush.msra.mxu2 %v109_v7  ;;  %648 = dma.vmem_to_hbm [thread:$0]  %s641_s1, 256, %s643_s15, [#allocation15], %s968_s16, %s968_s16, %s969_s17  }
  0x16   :  { %435 = vmatpush.msra.mxu1 %v112_v2  ;;  %741 = vmatpush.msra.mxu3 %v112_v2  ;;  %s971_s22 = smov [#allocation7]   ;;  %s573_s26 = sshll.u32 %s1093_s2, 4  ;;  %s574_s26 = int_to_ptr.hbm [resolvable:$true] %s573_s26 }
  0x17   :  { %242 = vmatpush.msra.mxu0 %v108_v4  ;;  %737 = vmatpush.msra.mxu2 %v108_v4  ;;  %s571_s23 = sshll.u32 %s971_s22, 4  ;;  %s972_s3 = smov [#allocation11]   ;;  %s572_s23 = int_to_ptr.vmem [resolvable:$true] %s571_s23 }
  0x18   :  { %342 = vxpose.xlu0.b32.cont [2/4] (short) %v112_v2, 128  ;;  %436 = vmatpush.msra.mxu1 %v111_v0  ;;  %s609_s2 = sshll.u32 %s972_s3, 4  ;;  %s611_s29 = sshll.u32 %s1096_s5, 4  ;;  %s610_s2 = int_to_ptr.vmem [resolvable:$true] %s609_s2  ;;  %s612_s29 = int_to_ptr.hbm [resolvable:$true] %s611_s29 }
  0x19   :  { %148 = vxpose.xlu1.b32.cont [2/4] (short) %v108_v4, 128  ;;  %243 = vmatpush.msra.mxu0 %v107_v1  ;;  %s973_s30 = smov [#allocation10]   ;;  %s600_s0 = sshll.u32 %s1095_s4, 4  ;;  %s601_s0 = int_to_ptr.hbm [resolvable:$true] %s600_s0 }
  0x1a   :  { %742 = vmatpush.msra.mxu3 %v111_v0  ;;  %738 = vmatpush.msra.mxu2 %v107_v1  ;;  %s598_s8 = sshll.u32 %s973_s30, 4  ;;  %s974_s1 = smov [#allocation13]   ;;  %s599_s8 = int_to_ptr.vmem [resolvable:$true] %s598_s8 }
  0x1b   :  { %s623_s13 = sshll.u32 %s974_s1, 4  ;;  %s624_s13 = int_to_ptr.vmem [resolvable:$true] %s623_s13 }
  0x1c   :  { %557 = vmatpush.msrb.mxu3 %v114_v8  ;;  %534 = vmatpush.msrb.mxu2 %v110_v9 }
  0x1e   :  { %558 = vmatpush.msrb.mxu3 %v113_v5  ;;  %535 = vmatpush.msrb.mxu2 %v109_v7 }
  0x20   :  { %559 = vmatpush.msrb.mxu3 %v112_v2  ;;  %536 = vmatpush.msrb.mxu2 %v108_v4 }
  0x21   :  { %343 = vxpose.xlu0.b32.cont [3/4] (short) %v113_v5, 128  ;;  %149 = vxpose.xlu1.b32.cont [3/4] (short) %v109_v7, 128 }
  0x22   :  { %560 = vmatpush.msrb.mxu3 %v111_v0  ;;  %537 = vmatpush.msrb.mxu2 %v107_v1 }
  0x29   :  { %344 = vxpose.xlu0.b32.end [4/4] (short) %v114_v8, 128  ;;  %150 = vxpose.xlu1.b32.end [4/4] (short) %v110_v9, 128 }
  0xb5   :  { %v357_v12 = vpop.trf.xlu0  ;;  %v163_v13 = vpop.trf.xlu1 }
  0xb6   :  { %695 = vmatmul.msk.f32.vlgmr.msra.gmra.mxu1 %vm179_vm0, %v357_v12  ;;  %679 = vmatmul.msk.f32.vlgmr.msra.gmra.mxu0 %vm179_vm0, %v163_v13 }
  0xbd   :  { %v358_v14 = vpop.trf.xlu0  ;;  %v164_v15 = vpop.trf.xlu1 }
  0xbe   :  { %696 = vmatmul.msk.f32.gmra.mxu1 %vm179_vm0, %v358_v14  ;;  %680 = vmatmul.msk.f32.gmra.mxu0 %vm179_vm0, %v164_v15  ;;  %v544_v14 = vld [vmem:[#allocation11] sm:$0x1]  ;;  %v518_v15 = vld [vmem:[#allocation10] sm:$0x1] }
  0xc5   :  { %v359_v16 = vpop.trf.xlu0  ;;  %v165_v17 = vpop.trf.xlu1 }
  0xc6   :  { %697 = vmatmul.msk.f32.gmra.mxu1 %vm179_vm0, %v359_v16  ;;  %681 = vmatmul.msk.f32.gmra.mxu0 %vm179_vm0, %v165_v17 }
  0xcd   :  { %v360_v18 = vpop.trf.xlu0  ;;  %v166_v19 = vpop.trf.xlu1 }
  0xce   :  { %698 = vmatmul.msk.f32.gmra.mxu1 %vm179_vm0, %v360_v18  ;;  %682 = vmatmul.msk.f32.gmra.mxu0 %vm179_vm0, %v166_v19 }
  0xd5   :  { %v361_v20 = vpop.trf.xlu0  ;;  %v167_v21 = vpop.trf.xlu1 }
  0xd6   :  { %699 = vmatmul.msk.f32.gmra.mxu1 %vm179_vm0, %v361_v20  ;;  %683 = vmatmul.msk.f32.gmra.mxu0 %vm179_vm0, %v167_v21 }
  0xdd   :  { %v362_v22 = vpop.trf.xlu0  ;;  %v168_v23 = vpop.trf.xlu1 }
  0xde   :  { %700 = vmatmul.msk.f32.gmra.mxu1 %vm179_vm0, %v362_v22  ;;  %684 = vmatmul.msk.f32.gmra.mxu0 %vm179_vm0, %v168_v23 }
  0xe5   :  { %v363_v24 = vpop.trf.xlu0  ;;  %v169_v25 = vpop.trf.xlu1 }
  0xe6   :  { %701 = vmatmul.msk.f32.gmra.mxu1 %vm179_vm0, %v363_v24  ;;  %685 = vmatmul.msk.f32.gmra.mxu0 %vm179_vm0, %v169_v25 }
  0xed   :  { %v364_v26 = vpop.trf.xlu0  ;;  %v170_v27 = vpop.trf.xlu1 }
  0xee   :  { %702 = vmatmul.msk.f32.gmra.mxu1 %vm179_vm0, %v364_v26  ;;  %686 = vmatmul.msk.f32.gmra.mxu0 %vm179_vm0, %v170_v27 }
  0xf5   :  { %v365_v28 = vpop.trf.xlu0  ;;  %v171_v29 = vpop.trf.xlu1 }
  0xf6   :  { %703 = vmatmul.msk.f32.gmra.mxu1 %vm179_vm0, %v365_v28  ;;  %687 = vmatmul.msk.f32.gmra.mxu0 %vm179_vm0, %v171_v29 }
  0xfd   :  { %v366_v30 = vpop.trf.xlu0  ;;  %v172_v31 = vpop.trf.xlu1 }
  0xfe   :  { %704 = vmatmul.msk.f32.vlgmr.msra.gmra.mxu3 %vm179_vm0, %v366_v30  ;;  %688 = vmatmul.msk.f32.vlgmr.msra.gmra.mxu2 %vm179_vm0, %v172_v31 }
 0x105   :  { %v367_v32 = vpop.trf.xlu0  ;;  %v173_v33 = vpop.trf.xlu1 }
 0x106   :  { %705 = vmatmul.msk.f32.gmra.mxu3 %vm179_vm0, %v367_v32  ;;  %689 = vmatmul.msk.f32.gmra.mxu2 %vm179_vm0, %v173_v33 }
 0x10d   :  { %v368_v34 = vpop.trf.xlu0  ;;  %v174_v35 = vpop.trf.xlu1 }
 0x10e   :  { %706 = vmatmul.msk.f32.gmra.mxu3 %vm179_vm0, %v368_v34  ;;  %690 = vmatmul.msk.f32.gmra.mxu2 %vm179_vm0, %v174_v35 }
 0x115   :  { %v369_v37 = vpop.trf.xlu0  ;;  %v175_v38 = vpop.trf.xlu1 }
 0x116   :  { %707 = vmatmul.msk.f32.gmra.mxu3 %vm179_vm0, %v369_v37  ;;  %691 = vmatmul.msk.f32.gmra.mxu2 %vm179_vm0, %v175_v38 }
 0x11d   :  { %v370_v39 = vpop.trf.xlu0  ;;  %v176_v40 = vpop.trf.xlu1 }
 0x11e   :  { %708 = vmatmul.msk.f32.gmra.mxu3 %vm179_vm0, %v370_v39  ;;  %692 = vmatmul.msk.f32.gmra.mxu2 %vm179_vm0, %v176_v40 }
 0x125   :  { %v371_v41 = vpop.trf.xlu0  ;;  %v177_v42 = vpop.trf.xlu1 }
 0x126   :  { %709 = vmatmul.msk.f32.gmra.mxu3 %vm179_vm0, %v371_v41  ;;  %693 = vmatmul.msk.f32.gmra.mxu2 %vm179_vm0, %v177_v42 }
 0x12d   :  { %v372_v43 = vpop.trf.xlu0  ;;  %v178_v44 = vpop.trf.xlu1 }
 0x12e   :  { %710 = vmatmul.msk.f32.gmra.mxu3 %vm179_vm0, %v372_v43  ;;  %694 = vmatmul.msk.f32.gmra.mxu2 %vm179_vm0, %v178_v44 }
 0x133   :  { %v438_v45 = vpop.f32.mrf.mxu1  ;;  %v245_v46 = vpop.f32.mrf.mxu0 }
 0x134   :  { %502 = vst [vmem:[#allocation8] sm:$0xff] %v438_v45 }
 0x135   :  { %309 = vst [vmem:[#allocation7] sm:$0xff] %v245_v46 }
 0x136   :  { %712 = vmatmul.msk.f32.vlgmr.msrb.gmra.mxu3 %vm179_vm0, %v966_v47  ;;  %711 = vmatmul.msk.f32.vlgmr.msrb.gmra.mxu2 %vm179_vm0, %v966_v47 }
 0x13b   :  { %v441_v48 = vpop.f32.mrf.mxu1  ;;  %v248_v49 = vpop.f32.mrf.mxu0 }
 0x13c   :  { %503 = vst [vmem:[#allocation8 + $0x8] sm:$0xff] %v441_v48 }
 0x13d   :  { %310 = vst [vmem:[#allocation7 + $0x8] sm:$0xff] %v248_v49 }
 0x143   :  { %v444_v50 = vpop.f32.mrf.mxu1  ;;  %v251_v51 = vpop.f32.mrf.mxu0 }
 0x144   :  { %504 = vst [vmem:[#allocation8 + $0x10] sm:$0xff] %v444_v50 }
 0x145   :  { %311 = vst [vmem:[#allocation7 + $0x10] sm:$0xff] %v251_v51 }
 0x14b   :  { %v447_v52 = vpop.f32.mrf.mxu1  ;;  %v254_v53 = vpop.f32.mrf.mxu0 }
 0x14c   :  { %505 = vst [vmem:[#allocation8 + $0x18] sm:$0xff] %v447_v52 }
 0x14d   :  { %312 = vst [vmem:[#allocation7 + $0x18] sm:$0xff] %v254_v53 }
 0x153   :  { %v450_v54 = vpop.f32.mrf.mxu1  ;;  %v257_v55 = vpop.f32.mrf.mxu0 }
 0x154   :  { %506 = vst [vmem:[#allocation8 + $0x20] sm:$0xff] %v450_v54 }
 0x155   :  { %313 = vst [vmem:[#allocation7 + $0x20] sm:$0xff] %v257_v55 }
 0x15b   :  { %v453_v56 = vpop.f32.mrf.mxu1  ;;  %v260_v57 = vpop.f32.mrf.mxu0 }
 0x15c   :  { %507 = vst [vmem:[#allocation8 + $0x28] sm:$0xff] %v453_v56 }
 0x15d   :  { %314 = vst [vmem:[#allocation7 + $0x28] sm:$0xff] %v260_v57 }
 0x163   :  { %v456_v58 = vpop.f32.mrf.mxu1  ;;  %v263_v59 = vpop.f32.mrf.mxu0 }
 0x164   :  { %508 = vst [vmem:[#allocation8 + $0x30] sm:$0xff] %v456_v58 }
 0x165   :  { %315 = vst [vmem:[#allocation7 + $0x30] sm:$0xff] %v263_v59 }
 0x16b   :  { %v459_v60 = vpop.f32.mrf.mxu1  ;;  %v266_v61 = vpop.f32.mrf.mxu0 }
 0x16c   :  { %509 = vst [vmem:[#allocation8 + $0x38] sm:$0xff] %v459_v60 }
 0x16d   :  { %316 = vst [vmem:[#allocation7 + $0x38] sm:$0xff] %v266_v61 }
 0x173   :  { %v462_v62 = vpop.f32.mrf.mxu1  ;;  %v269_v63 = vpop.f32.mrf.mxu0 }
 0x174   :  { %510 = vst [vmem:[#allocation8 + $0x40] sm:$0xff] %v462_v62 }
 0x175   :  { %317 = vst [vmem:[#allocation7 + $0x40] sm:$0xff] %v269_v63 }
 0x181   :  { %v465_v0 = vpop.f32.mrf.mxu3  ;;  %v272_v1 = vpop.f32.mrf.mxu2 }
 0x182   :  { %511 = vst [vmem:[#allocation8 + $0x48] sm:$0xff] %v465_v0 }
 0x183   :  { %318 = vst [vmem:[#allocation7 + $0x48] sm:$0xff] %v272_v1 }
 0x189   :  { %v468_v2 = vpop.f32.mrf.mxu3  ;;  %v275_v3 = vpop.f32.mrf.mxu2 }
 0x18a   :  { %512 = vst [vmem:[#allocation8 + $0x50] sm:$0xff] %v468_v2 }
 0x18b   :  { %319 = vst [vmem:[#allocation7 + $0x50] sm:$0xff] %v275_v3 }
 0x191   :  { %v471_v4 = vpop.f32.mrf.mxu3  ;;  %v278_v5 = vpop.f32.mrf.mxu2 }
 0x192   :  { %513 = vst [vmem:[#allocation8 + $0x58] sm:$0xff] %v471_v4 }
 0x193   :  { %320 = vst [vmem:[#allocation7 + $0x58] sm:$0xff] %v278_v5 }
 0x199   :  { %v474_v6 = vpop.f32.mrf.mxu3  ;;  %v281_v7 = vpop.f32.mrf.mxu2 }
 0x19a   :  { %514 = vst [vmem:[#allocation8 + $0x60] sm:$0xff] %v474_v6 }
 0x19b   :  { %321 = vst [vmem:[#allocation7 + $0x60] sm:$0xff] %v281_v7 }
 0x1a1   :  { %v477_v8 = vpop.f32.mrf.mxu3  ;;  %v284_v9 = vpop.f32.mrf.mxu2 }
 0x1a2   :  { %515 = vst [vmem:[#allocation8 + $0x68] sm:$0xff] %v477_v8 }
 0x1a3   :  { %322 = vst [vmem:[#allocation7 + $0x68] sm:$0xff] %v284_v9 }
 0x1a9   :  { %v480_v10 = vpop.f32.mrf.mxu3  ;;  %v287_v11 = vpop.f32.mrf.mxu2 }
 0x1aa   :  { %516 = vst [vmem:[#allocation8 + $0x70] sm:$0xff] %v480_v10 }
 0x1ab   :  { %323 = vst [vmem:[#allocation7 + $0x70] sm:$0xff] %v287_v11 }
 0x1b1   :  { %v483_v12 = vpop.f32.mrf.mxu3  ;;  %v290_v13 = vpop.f32.mrf.mxu2 }
 0x1b2   :  { %517 = vst [vmem:[#allocation8 + $0x78] sm:$0xff] %v483_v12 }
 0x1b3   :  { %324 = vst [vmem:[#allocation7 + $0x78] sm:$0xff] %v290_v13  ;;  %592 = dma.vmem_to_hbm [thread:$0]  %s585_s18, 2048, %s587_s21, [#allocation9], %s962_s9, %s962_s9, %s963_s10  }
 0x1b4   :  { %579 = dma.vmem_to_hbm [thread:$0]  %s572_s23, 2048, %s574_s26, [#allocation4], %s962_s9, %s962_s9, %s963_s10  }
 0x1b5   :  { %s625_s10 = sshll.u32 %s1097_s6, 4  ;;  %s626_s10 = int_to_ptr.hbm [resolvable:$true] %s625_s10 }
 0x1b9   :  { %v562_v16 = vpop.f32.mrf.mxu3  ;;  %v539_v17 = vpop.f32.mrf.mxu2 }
 0x1ba   :  { %v565_v18 = vadd.f32 %v562_v16, %v544_v14  ;;  %v542_v19 = vadd.f32 %v539_v17, %v518_v15 }
 0x1bc   :  { %566 = vst [vmem:[#allocation11] sm:$0x1] %v565_v18 }
 0x1bd   :  { %543 = vst [vmem:[#allocation10] sm:$0x1] %v542_v19  ;;  %614 = dma.vmem_to_hbm [thread:$0]  %s610_s2, 16, %s612_s29, [#allocation12]  }
 0x1be   :  { %603 = dma.vmem_to_hbm [thread:$0]  %s599_s8, 16, %s601_s0, [#allocation9]  }
 0x1bf   :  { %631 = dma.vmem_to_hbm [thread:$0]  %s624_s13, 256, %s626_s10, [#allocation12], %s968_s16, %s968_s16, %s969_s17  }
 0x1c0   :  { %953 = dma.done.wait [#allocation4], 2048  }
 0x1c1   :  { %954 = vsyncadd [#allocation4], 4294965248 }
 0x1c2   :  { %955 = dma.done.wait [#allocation9], 2064  }
 0x1c3   :  { %956 = vsyncadd [#allocation9], 4294965232 }
 0x1c4   :  { %957 = dma.done.wait [#allocation12], 272  }
 0x1c5   :  { %958 = vsyncadd [#allocation12], 4294967024 }
 0x1c6   :  { %959 = dma.done.wait [#allocation15], 256  }
 0x1c7   :  { %960 = vsyncadd [#allocation15], 4294967040 }
 0x1c8   :  { %673 = vsyncpa [#allocation3], 1 }
 0x1c9   :  { %674 = vsyncpa [#allocation6], 1 }
 0x1ca   :  { %675 = vsyncpa [#allocation4], 1 }
 0x1cb   :  { %676 = vsyncpa [#allocation9], 1 }
 0x1cc   :  { %677 = vsyncpa [#allocation12], 1 }
 0x1cd   :  { %678 = vsyncpa [#allocation15], 1 }

</bundles_post_ra>
